<compile_context>
chip_gen: v7x
topology: tpu7x:2x2x1
jax: 0.10.0
libtpu: 0.0.40
codegen_flags: <defaults>
</compile_context>

<pallas_src>
import functools

import jax
import jax.numpy as jnp
from jax.experimental import pallas as pl
from jax.experimental.pallas import tpu as pltpu

EPS = 1e-6  # matches nn.LayerNorm(..., eps=1e-06) in the PyTorch module


def _layer_norm_f32(x, gamma_b, beta_b):
    """LayerNorm with pre-broadcast affine params (gamma_b/beta_b already (rows, d))."""
    mu = jnp.mean(x, axis=-1, keepdims=True)
    xc = x - mu
    var = jnp.mean(xc * xc, axis=-1, keepdims=True)
    return xc * jax.lax.rsqrt(var + EPS) * gamma_b + beta_b


def _cross_attn_kernel(params_ref, q_ref, k_ref, v_ref, o_ref,
                       qn_ref, acc_ref, m_ref, l_ref,
                       *, g_heads, d, mxu_dtype):
    """One (batch, head-group, q-tile, kv-tile) step.

    params_ref: (4, d) f32   rows = [q_gamma*scale, q_beta*scale, k_gamma, k_beta]
    q_ref     : (1, tq, g*d)       k_ref / v_ref : (1, tk, g*d)
    o_ref     : (1, tq, g*d)
    qn_ref    : (tq, g*d)  VMEM    LayerNormed q, cached across kv steps
    acc_ref   : (tq, g*d)  VMEM f32 un-normalized softmax(QK^T)V accumulator
    m_ref/l_ref: (g, tq, 1) VMEM f32 per-head online-softmax row max / row sum
    """
    ki = pl.program_id(3)
    tq = q_ref.shape[1]
    tk = k_ref.shape[1]

    qg = params_ref[0:1, :]
    qb = params_ref[1:2, :]
    kg = params_ref[2:3, :]
    kb = params_ref[3:4, :]
    # Hoisted broadcasts: one per grid step instead of one per head.
    kg_b = jnp.broadcast_to(kg, (tk, d))
    kb_b = jnp.broadcast_to(kb, (tk, d))

    @pl.when(ki == 0)
    def _init():
        m_ref[...] = jnp.full_like(m_ref, -jnp.inf)
        l_ref[...] = jnp.zeros_like(l_ref)
        acc_ref[...] = jnp.zeros_like(acc_ref)
        # LayerNorm q once per (batch, head-group, q-tile); 1/sqrt(d) is folded
        # into qg/qb so no per-score multiply is needed later.
        qg_b = jnp.broadcast_to(qg, (tq, d))
        qb_b = jnp.broadcast_to(qb, (tq, d))
        for h in range(g_heads):
            q_h = q_ref[0, :, h * d:(h + 1) * d].astype(jnp.float32)
            qn_ref[:, h * d:(h + 1) * d] = _layer_norm_f32(
                q_h, qg_b, qb_b).astype(qn_ref.dtype)

    dn_nt = (((1,), (1,)), ((), ()))   # contract last dims: q @ k^T without relayout
    dn_nn = (((1,), (0,)), ((), ()))   # ordinary matmul: p @ v

    for h in range(g_heads):           # static unroll over heads in this group
        sl = slice(h * d, (h + 1) * d)
        k_h = k_ref[0, :, sl].astype(jnp.float32)
        v_h = v_ref[0, :, sl].astype(mxu_dtype)
        kn = _layer_norm_f32(k_h, kg_b, kb_b).astype(mxu_dtype)
        qn = qn_ref[:, sl]

        s = jax.lax.dot_general(qn, kn, dn_nt,
                                preferred_element_type=jnp.float32)   # (tq, tk)

        m_prev = m_ref[h]                                              # (tq, 1)
        l_prev = l_ref[h]
        m_new = jnp.maximum(m_prev, jnp.max(s, axis=-1, keepdims=True))
        alpha = jnp.exp(m_prev - m_new)
        # TODO(synk): on v6e/v7x, exp could run in bf16 for 2x EUP throughput;
        # kept f32 here to stay accurate and generation-agnostic (v5e has no
        # bf16 EUP path).
        p = jnp.exp(s - m_new)
        l_ref[h] = alpha * l_prev + jnp.sum(p, axis=-1, keepdims=True)
        m_ref[h] = m_new

        pv = jax.lax.dot_general(p.astype(mxu_dtype), v_h, dn_nn,
                                 preferred_element_type=jnp.float32)  # (tq, d)
        acc_ref[:, sl] = alpha * acc_ref[:, sl] + pv

    @pl.when(ki == pl.num_programs(3) - 1)
    def _finalize():
        for h in range(g_heads):
            sl = slice(h * d, (h + 1) * d)
            l_h = l_ref[h]
            inv = pl.reciprocal(l_h, approx=True)       # EUP
            inv = inv * (2.0 - l_h * inv)               # one Newton step -> ~f32
            acc_ref[:, sl] = acc_ref[:, sl] * inv
        o_ref[0] = acc_ref[...].astype(o_ref.dtype)     # single lane-dense store


def _pick_tile(n, cap):
    """Largest tile <= cap that divides n and is sublane-aligned, else full n."""
    if n <= cap:
        return n
    for t in range(cap, 7, -1):
        if n % t == 0 and t % 8 == 0:
            return t
    # TODO(synk): mask partial kv tiles so non-divisible / padded n_data can be
    # tiled instead of falling back to a single full-length kv block.
    return n


def _vmem_capacity_bytes():
    try:
        cap = int(pltpu.get_tpu_info().vmem_capacity_bytes)
        if cap > 0:
            return cap
    except Exception:
        pass
    return 64 << 20   # conservative (v7x-sized) fallback


def _step_vmem_bytes(g, d, tq, tk, in_bytes, mxu_bytes):
    gw = g * d
    io = 2 * in_bytes * (tq * gw + 2 * tk * gw + tq * gw)   # double-buffered q,k,v,out
    scratch = 4 * tq * gw + mxu_bytes * tq * gw + 2 * 4 * g * tq * 128
    temps = 3 * 4 * tq * tk                                 # score / prob f32 tiles
    return io + scratch + temps


def _pick_head_group(heads, d, tq, tk, in_bytes, mxu_bytes, budget_bytes):
    """Largest head-group g with a lane-dense (g*d) block width that fits VMEM."""
    cands = [g for g in range(1, heads + 1)
             if heads % g == 0 and ((g * d) % 128 == 0 or g == heads)]
    fits = [g for g in cands
            if _step_vmem_bytes(g, d, tq, tk, in_bytes, mxu_bytes) <= budget_bytes]
    return max(fits) if fits else min(cands)


def qkv_multihead_cross_attention(q, kv, params, heads, *, mxu_dtype=None,
                                  q_tile_cap=512, kv_tile_cap=1024):
    """Pallas implementation of QKVMultiheadCrossAttention.forward."""
    bs, n_ctx, q_width = q.shape
    kv_bs, n_data, kv_width = kv.shape
    assert kv_bs == bs
    d = kv_width // heads // 2                  # per-head dim of q, k, v
    assert q_width == heads * d, "q width must equal heads * (kv_width // heads // 2)"

    # MXU is bf16-native on all generations; keep f32 accumulation.
    if mxu_dtype is None:
        mxu_dtype = jnp.bfloat16 if q.dtype == jnp.dtype(jnp.float32) else q.dtype
    mxu_dtype = jnp.dtype(mxu_dtype)

    scale = 1.0 / float(d) ** 0.5               # F.scaled_dot_product_attention default
    ln_params = jnp.stack([
        params["q_gamma"].reshape(d) * scale,
        params["q_beta"].reshape(d) * scale,
        params["k_gamma"].reshape(d),
        params["k_beta"].reshape(d),
    ]).astype(jnp.float32)

    # De-interleave kv -> contiguous k and v slabs (one fused XLA pass), so the
    # kernel's per-head slices never start at 128h+64 lane offsets.
    kv4 = kv.reshape(bs, n_data, heads, 2, d)
    k = kv4[:, :, :, 0, :].reshape(bs, n_data, heads * d)
    v = kv4[:, :, :, 1, :].reshape(bs, n_data, heads * d)

    tq = _pick_tile(n_ctx, q_tile_cap)
    tk = _pick_tile(n_data, kv_tile_cap)

    vmem_limit = (_vmem_capacity_bytes() * 3) // 4          # ~96 MiB v5e/v6e, ~48 MiB v7x
    group_budget = (vmem_limit * 3) // 4
    g_heads = _pick_head_group(heads, d, tq, tk, q.dtype.itemsize,
                               mxu_dtype.itemsize, group_budget)
    n_groups = heads // g_heads
    gw = g_heads * d

    kernel = functools.partial(_cross_attn_kernel, g_heads=g_heads, d=d,
                               mxu_dtype=mxu_dtype)

    grid = (bs, n_groups, n_ctx // tq, n_data // tk)

    # TODO(synk): no masking for padded / ragged kv rows; callers must pass
    # exactly n_data valid rows.
    out = pl.pallas_call(
        kernel,
        out_shape=jax.ShapeDtypeStruct((bs, n_ctx, heads * d), q.dtype),
        grid=grid,
        in_specs=[
            pl.BlockSpec((4, d), lambda b, j, qi, ki: (0, 0)),            # packed LN params
            pl.BlockSpec((1, tq, gw), lambda b, j, qi, ki: (b, qi, j)),   # q tile
            pl.BlockSpec((1, tk, gw), lambda b, j, qi, ki: (b, ki, j)),   # k tile
            pl.BlockSpec((1, tk, gw), lambda b, j, qi, ki: (b, ki, j)),   # v tile
        ],
        out_specs=pl.BlockSpec((1, tq, gw), lambda b, j, qi, ki: (b, qi, j)),
        scratch_shapes=[
            pltpu.VMEM((tq, gw), mxu_dtype),             # cached LayerNormed q
            pltpu.VMEM((tq, gw), jnp.float32),           # output accumulator
            pltpu.VMEM((g_heads, tq, 1), jnp.float32),   # online-softmax row max
            pltpu.VMEM((g_heads, tq, 1), jnp.float32),   # online-softmax row sum
        ],
        compiler_params=pltpu.CompilerParams(
            dimension_semantics=("parallel", "parallel", "parallel", "arbitrary"),
            vmem_limit_bytes=vmem_limit),
    )(ln_params, q, k, v)
    return out


def _reference(q, kv, params, heads):
    """Pure-JAX reference mirroring the PyTorch forward."""
    bs, n_ctx, _ = q.shape
    _, n_data, kv_width = kv.shape
    d = kv_width // heads // 2

    def ln(x, g, b):
        mu = jnp.mean(x, axis=-1, keepdims=True)
        var = jnp.mean(jnp.square(x - mu), axis=-1, keepdims=True)
        return (x - mu) * jax.lax.rsqrt(var + EPS) * g + b

    qh = q.reshape(bs, n_ctx, heads, d)
    kvh = kv.reshape(bs, n_data, heads, 2 * d)
    kh, vh = kvh[..., :d], kvh[..., d:]
    qh = ln(qh, params["q_gamma"], params["q_beta"])
    kh = ln(kh, params["k_gamma"], params["k_beta"])
    qh, kh, vh = (t.transpose(0, 2, 1, 3) for t in (qh, kh, vh))  # b h n d
    s = jnp.einsum("bhqd,bhkd->bhqk", qh, kh) / jnp.sqrt(jnp.float32(d))
    p = jax.nn.softmax(s, axis=-1)
    o = jnp.einsum("bhqk,bhkd->bhqd", p, vh)
    return o.transpose(0, 2, 1, 3).reshape(bs, n_ctx, heads * d)


if __name__ == "__main__":
    key = jax.random.PRNGKey(0)
    kq, kkv, k1, k2, k3, k4, kq2, kkv2 = jax.random.split(key, 8)

    d = 64  # per-head dim (matches LayerNorm(width // heads) in the module)
    params = {
        "q_gamma": 1.0 + 0.1 * jax.random.normal(k1, (d,), dtype=jnp.float32),
        "q_beta": 0.1 * jax.random.normal(k2, (d,), dtype=jnp.float32),
        "k_gamma": 1.0 + 0.1 * jax.random.normal(k3, (d,), dtype=jnp.float32),
        "k_beta": 0.1 * jax.random.normal(k4, (d,), dtype=jnp.float32),
    }

    # --- Test 1: heads=2, q width 128, kv width 256, single kv step -----------
    heads, bs, n_ctx, n_data = 2, 2, 8, 16
    q = jax.random.normal(kq, (bs, n_ctx, heads * d), dtype=jnp.float32)
    kv = jax.random.normal(kkv, (bs, n_data, heads * 2 * d), dtype=jnp.float32)
    ref = _reference(q, kv, params, heads)

    # f32 MXU path: only approx-reciprocal+Newton / scale-folding rounding.
    out = jax.block_until_ready(
        qkv_multihead_cross_attention(q, kv, params, heads, mxu_dtype=jnp.float32))
    assert out.shape == ref.shape, out.shape
    assert jnp.allclose(out, ref, atol=1e-4, rtol=1e-4), \
        float(jnp.max(jnp.abs(out - ref)))

    # Default bf16 MXU path (f32 accumulation): looser tolerance vs f32 reference.
    out_bf = jax.block_until_ready(qkv_multihead_cross_attention(q, kv, params, heads))
    assert jnp.allclose(out_bf, ref, atol=3e-2, rtol=3e-2), \
        float(jnp.max(jnp.abs(out_bf - ref)))

    # --- Test 2: multi q-tile / multi kv-tile (exercises online softmax) ------
    heads2, bs2, n_ctx2, n_data2 = 4, 1, 16, 32
    q2 = jax.random.normal(kq2, (bs2, n_ctx2, heads2 * d), dtype=jnp.float32)
    kv2 = jax.random.normal(kkv2, (bs2, n_data2, heads2 * 2 * d), dtype=jnp.float32)
    ref2 = _reference(q2, kv2, params, heads2)
    out2 = jax.block_until_ready(
        qkv_multihead_cross_attention(q2, kv2, params, heads2, mxu_dtype=jnp.float32,
                                      q_tile_cap=8, kv_tile_cap=16))
    assert out2.shape == ref2.shape, out2.shape
    assert jnp.allclose(out2, ref2, atol=1e-4, rtol=1e-4), \
        float(jnp.max(jnp.abs(out2 - ref2)))

    print("KERNEL_OK")
</pallas_src>

<mosaic_0001>
module attributes {stable_mosaic.version = 11 : i64} {
  func.func @_cross_attn_kernel(%arg0: i32, %arg1: i32, %arg2: i32, %arg3: i32, %arg4: memref<4x64xf32, #tpu.memory_space<vmem>>, %arg5: memref<1x8x128xf32, #tpu.memory_space<vmem>>, %arg6: memref<1x16x128xf32, #tpu.memory_space<vmem>>, %arg7: memref<1x16x128xf32, #tpu.memory_space<vmem>>, %arg8: memref<1x8x128xf32, #tpu.memory_space<vmem>>, %arg9: memref<8x128xf32, #tpu.memory_space<vmem>>, %arg10: memref<8x128xf32, #tpu.memory_space<vmem>>, %arg11: memref<2x8x1xf32, #tpu.memory_space<vmem>>, %arg12: memref<2x8x1xf32, #tpu.memory_space<vmem>>) attributes {dimension_semantics = [#tpu.dimension_semantics<parallel>, #tpu.dimension_semantics<parallel>, #tpu.dimension_semantics<parallel>, #tpu.dimension_semantics<arbitrary>], iteration_bounds = array<i64: 2, 1, 1, 1>, scalar_prefetch = 0 : i64, scratch_operands = 4 : i64, tpu.core_type = #tpu.core_type<tc>, window_params = [{pipeline_mode = #tpu.pipeline_mode<synchronous>, transform_indices = @transform_0, window_bounds = array<i64: 4, 64>}, {transform_indices = @transform_1, window_bounds = array<i64: 1, 8, 128>}, {transform_indices = @transform_2, window_bounds = array<i64: 1, 16, 128>}, {transform_indices = @transform_3, window_bounds = array<i64: 1, 16, 128>}, {transform_indices = @transform_4, window_bounds = array<i64: 1, 8, 128>}]} {
    %c0 = arith.constant 0 : index
    %c0_0 = arith.constant 0 : index
    %0 = vector.load %arg4[%c0, %c0_0] : memref<4x64xf32, #tpu.memory_space<vmem>>, vector<1x64xf32>
    %c1 = arith.constant 1 : index
    %c0_1 = arith.constant 0 : index
    %1 = vector.load %arg4[%c1, %c0_1] : memref<4x64xf32, #tpu.memory_space<vmem>>, vector<1x64xf32>
    %c2 = arith.constant 2 : index
    %c0_2 = arith.constant 0 : index
    %2 = vector.load %arg4[%c2, %c0_2] : memref<4x64xf32, #tpu.memory_space<vmem>>, vector<1x64xf32>
    %c3 = arith.constant 3 : index
    %c0_3 = arith.constant 0 : index
    %3 = vector.load %arg4[%c3, %c0_3] : memref<4x64xf32, #tpu.memory_space<vmem>>, vector<1x64xf32>
    %4 = vector.shape_cast %2 : vector<1x64xf32> to vector<1x64xf32>
    %5 = vector.broadcast %4 : vector<1x64xf32> to vector<16x64xf32>
    %6 = vector.shape_cast %3 : vector<1x64xf32> to vector<1x64xf32>
    %7 = vector.broadcast %6 : vector<1x64xf32> to vector<16x64xf32>
    %c0_i32 = arith.constant 0 : i32
    %8 = arith.cmpi eq, %arg3, %c0_i32 : i32
    %9 = arith.extui %8 : i1 to i32
    %c0_i32_4 = arith.constant 0 : i32
    %10 = arith.cmpi ne, %9, %c0_i32_4 : i32
    scf.if %10 {
      %cst_71 = arith.constant 0xFF800000 : f32
      %118 = vector.broadcast %cst_71 : f32 to vector<2x8x1xf32>
      %c0_72 = arith.constant 0 : index
      %c0_73 = arith.constant 0 : index
      %c0_74 = arith.constant 0 : index
      %119 = vector.load %arg11[%c0_72, %c0_73, %c0_74] : memref<2x8x1xf32, #tpu.memory_space<vmem>>, vector<2x8x1xf32>
      tpu.vector_store %arg11[%c0_72, %c0_73, %c0_74], %118 {strides = array<i32>} : memref<2x8x1xf32, #tpu.memory_space<vmem>>, vector<2x8x1xf32>,
      %cst_75 = arith.constant 0.000000e+00 : f32
      %120 = vector.broadcast %cst_75 : f32 to vector<2x8x1xf32>
      %c0_76 = arith.constant 0 : index
      %c0_77 = arith.constant 0 : index
      %c0_78 = arith.constant 0 : index
      %121 = vector.load %arg12[%c0_76, %c0_77, %c0_78] : memref<2x8x1xf32, #tpu.memory_space<vmem>>, vector<2x8x1xf32>
      tpu.vector_store %arg12[%c0_76, %c0_77, %c0_78], %120 {strides = array<i32>} : memref<2x8x1xf32, #tpu.memory_space<vmem>>, vector<2x8x1xf32>,
      %cst_79 = arith.constant 0.000000e+00 : f32
      %122 = vector.broadcast %cst_79 : f32 to vector<8x128xf32>
      %c0_80 = arith.constant 0 : index
      %c0_81 = arith.constant 0 : index
      %123 = vector.load %arg10[%c0_80, %c0_81] : memref<8x128xf32, #tpu.memory_space<vmem>>, vector<8x128xf32>
      tpu.vector_store %arg10[%c0_80, %c0_81], %122 {strides = array<i32>} : memref<8x128xf32, #tpu.memory_space<vmem>>, vector<8x128xf32>,
      %124 = vector.shape_cast %0 : vector<1x64xf32> to vector<1x64xf32>
      %125 = vector.broadcast %124 : vector<1x64xf32> to vector<8x64xf32>
      %126 = vector.shape_cast %1 : vector<1x64xf32> to vector<1x64xf32>
      %127 = vector.broadcast %126 : vector<1x64xf32> to vector<8x64xf32>
      %c0_82 = arith.constant 0 : index
      %c0_83 = arith.constant 0 : index
      %c0_84 = arith.constant 0 : index
      %128 = vector.load %arg5[%c0_82, %c0_83, %c0_84] : memref<1x8x128xf32, #tpu.memory_space<vmem>>, vector<1x8x64xf32>
      %129 = vector.shape_cast %128 : vector<1x8x64xf32> to vector<8x64xf32>
      %cst_85 = arith.constant dense<0.000000e+00> : vector<8xf32>
      %130 = vector.multi_reduction <add>, %129, %cst_85 [1] : vector<8x64xf32> to vector<8xf32>
      %131 = vector.shape_cast %130 : vector<8xf32> to vector<8x1xf32>
      %cst_86 = arith.constant 6.400000e+01 : f32
      %132 = vector.broadcast %cst_86 : f32 to vector<8x1xf32>
      %133 = arith.divf %131, %132 : vector<8x1xf32>
      %134 = vector.broadcast %133 : vector<8x1xf32> to vector<8x64xf32>
      %135 = arith.subf %129, %134 : vector<8x64xf32>
      %136 = arith.mulf %135, %135 : vector<8x64xf32>
      %cst_87 = arith.constant dense<0.000000e+00> : vector<8xf32>
      %137 = vector.multi_reduction <add>, %136, %cst_87 [1] : vector<8x64xf32> to vector<8xf32>
      %138 = vector.shape_cast %137 : vector<8xf32> to vector<8x1xf32>
      %cst_88 = arith.constant 6.400000e+01 : f32
      %139 = vector.broadcast %cst_88 : f32 to vector<8x1xf32>
      %140 = arith.divf %138, %139 : vector<8x1xf32>
      %cst_89 = arith.constant 9.99999997E-7 : f32
      %141 = vector.broadcast %cst_89 : f32 to vector<8x1xf32>
      %142 = arith.addf %140, %141 : vector<8x1xf32>
      %143 = math.rsqrt %142 : vector<8x1xf32>
      %144 = vector.broadcast %143 : vector<8x1xf32> to vector<8x64xf32>
      %145 = arith.mulf %135, %144 : vector<8x64xf32>
      %146 = arith.mulf %145, %125 : vector<8x64xf32>
      %147 = arith.addf %146, %127 : vector<8x64xf32>
      %c0_90 = arith.constant 0 : index
      %c0_91 = arith.constant 0 : index
      %148 = vector.load %arg9[%c0_90, %c0_91] : memref<8x128xf32, #tpu.memory_space<vmem>>, vector<8x64xf32>
      tpu.vector_store %arg9[%c0_90, %c0_91], %147 {strides = array<i32>} : memref<8x128xf32, #tpu.memory_space<vmem>>, vector<8x64xf32>,
      %c0_92 = arith.constant 0 : index
      %c0_93 = arith.constant 0 : index
      %c64_94 = arith.constant 64 : index
      %149 = vector.load %arg5[%c0_92, %c0_93, %c64_94] : memref<1x8x128xf32, #tpu.memory_space<vmem>>, vector<1x8x64xf32>
      %150 = vector.shape_cast %149 : vector<1x8x64xf32> to vector<8x64xf32>
      %cst_95 = arith.constant dense<0.000000e+00> : vector<8xf32>
      %151 = vector.multi_reduction <add>, %150, %cst_95 [1] : vector<8x64xf32> to vector<8xf32>
      %152 = vector.shape_cast %151 : vector<8xf32> to vector<8x1xf32>
      %cst_96 = arith.constant 6.400000e+01 : f32
      %153 = vector.broadcast %cst_96 : f32 to vector<8x1xf32>
      %154 = arith.divf %152, %153 : vector<8x1xf32>
      %155 = vector.broadcast %154 : vector<8x1xf32> to vector<8x64xf32>
      %156 = arith.subf %150, %155 : vector<8x64xf32>
      %157 = arith.mulf %156, %156 : vector<8x64xf32>
      %cst_97 = arith.constant dense<0.000000e+00> : vector<8xf32>
      %158 = vector.multi_reduction <add>, %157, %cst_97 [1] : vector<8x64xf32> to vector<8xf32>
      %159 = vector.shape_cast %158 : vector<8xf32> to vector<8x1xf32>
      %cst_98 = arith.constant 6.400000e+01 : f32
      %160 = vector.broadcast %cst_98 : f32 to vector<8x1xf32>
      %161 = arith.divf %159, %160 : vector<8x1xf32>
      %cst_99 = arith.constant 9.99999997E-7 : f32
      %162 = vector.broadcast %cst_99 : f32 to vector<8x1xf32>
      %163 = arith.addf %161, %162 : vector<8x1xf32>
      %164 = math.rsqrt %163 : vector<8x1xf32>
      %165 = vector.broadcast %164 : vector<8x1xf32> to vector<8x64xf32>
      %166 = arith.mulf %156, %165 : vector<8x64xf32>
      %167 = arith.mulf %166, %125 : vector<8x64xf32>
      %168 = arith.addf %167, %127 : vector<8x64xf32>
      %c0_100 = arith.constant 0 : index
      %c64_101 = arith.constant 64 : index
      %169 = vector.load %arg9[%c0_100, %c64_101] : memref<8x128xf32, #tpu.memory_space<vmem>>, vector<8x64xf32>
      tpu.vector_store %arg9[%c0_100, %c64_101], %168 {strides = array<i32>} : memref<8x128xf32, #tpu.memory_space<vmem>>, vector<8x64xf32>,
    } else {
    }
    %c0_5 = arith.constant 0 : index
    %c0_6 = arith.constant 0 : index
    %c0_7 = arith.constant 0 : index
    %11 = vector.load %arg6[%c0_5, %c0_6, %c0_7] : memref<1x16x128xf32, #tpu.memory_space<vmem>>, vector<1x16x64xf32>
    %12 = vector.shape_cast %11 : vector<1x16x64xf32> to vector<16x64xf32>
    %c0_8 = arith.constant 0 : index
    %c0_9 = arith.constant 0 : index
    %c0_10 = arith.constant 0 : index
    %13 = vector.load %arg7[%c0_8, %c0_9, %c0_10] : memref<1x16x128xf32, #tpu.memory_space<vmem>>, vector<1x16x64xf32>
    %14 = vector.shape_cast %13 : vector<1x16x64xf32> to vector<16x64xf32>
    %cst = arith.constant dense<0.000000e+00> : vector<16xf32>
    %15 = vector.multi_reduction <add>, %12, %cst [1] : vector<16x64xf32> to vector<16xf32>
    %16 = vector.shape_cast %15 : vector<16xf32> to vector<16x1xf32>
    %cst_11 = arith.constant 6.400000e+01 : f32
    %17 = vector.broadcast %cst_11 : f32 to vector<16x1xf32>
    %18 = arith.divf %16, %17 : vector<16x1xf32>
    %19 = vector.broadcast %18 : vector<16x1xf32> to vector<16x64xf32>
    %20 = arith.subf %12, %19 : vector<16x64xf32>
    %21 = arith.mulf %20, %20 : vector<16x64xf32>
    %cst_12 = arith.constant dense<0.000000e+00> : vector<16xf32>
    %22 = vector.multi_reduction <add>, %21, %cst_12 [1] : vector<16x64xf32> to vector<16xf32>
    %23 = vector.shape_cast %22 : vector<16xf32> to vector<16x1xf32>
    %cst_13 = arith.constant 6.400000e+01 : f32
    %24 = vector.broadcast %cst_13 : f32 to vector<16x1xf32>
    %25 = arith.divf %23, %24 : vector<16x1xf32>
    %cst_14 = arith.constant 9.99999997E-7 : f32
    %26 = vector.broadcast %cst_14 : f32 to vector<16x1xf32>
    %27 = arith.addf %25, %26 : vector<16x1xf32>
    %28 = math.rsqrt %27 : vector<16x1xf32>
    %29 = vector.broadcast %28 : vector<16x1xf32> to vector<16x64xf32>
    %30 = arith.mulf %20, %29 : vector<16x64xf32>
    %31 = arith.mulf %30, %5 : vector<16x64xf32>
    %32 = arith.addf %31, %7 : vector<16x64xf32>
    %c0_15 = arith.constant 0 : index
    %c0_16 = arith.constant 0 : index
    %33 = vector.load %arg9[%c0_15, %c0_16] : memref<8x128xf32, #tpu.memory_space<vmem>>, vector<8x64xf32>
    %cst_17 = arith.constant dense<0.000000e+00> : vector<8x16xf32>
    %34 = tpu.matmul %33, %32, %cst_17 {dimension_numbers = #tpu.dot_dimension_numbers<[1], [1], [0], [0], [0, 0, 1, 0], [], []>} : vector<8x64xf32>, vector<16x64xf32>, vector<8x16xf32> -> vector<8x16xf32>
    %c0_18 = arith.constant 0 : index
    %c0_19 = arith.constant 0 : index
    %c0_20 = arith.constant 0 : index
    %35 = vector.load %arg11[%c0_18, %c0_19, %c0_20] : memref<2x8x1xf32, #tpu.memory_space<vmem>>, vector<1x8x1xf32>
    %36 = vector.shape_cast %35 : vector<1x8x1xf32> to vector<8x1xf32>
    %c0_21 = arith.constant 0 : index
    %c0_22 = arith.constant 0 : index
    %c0_23 = arith.constant 0 : index
    %37 = vector.load %arg12[%c0_21, %c0_22, %c0_23] : memref<2x8x1xf32, #tpu.memory_space<vmem>>, vector<1x8x1xf32>
    %38 = vector.shape_cast %37 : vector<1x8x1xf32> to vector<8x1xf32>
    %cst_24 = arith.constant dense<0xFF800000> : vector<8xf32>
    %39 = vector.multi_reduction <maximumf>, %34, %cst_24 [1] : vector<8x16xf32> to vector<8xf32>
    %40 = vector.shape_cast %39 : vector<8xf32> to vector<8x1xf32>
    %41 = arith.maximumf %36, %40 : vector<8x1xf32>
    %42 = arith.subf %36, %41 : vector<8x1xf32>
    %43 = math.exp %42 : vector<8x1xf32>
    %44 = vector.broadcast %41 : vector<8x1xf32> to vector<8x16xf32>
    %45 = arith.subf %34, %44 : vector<8x16xf32>
    %46 = math.exp %45 : vector<8x16xf32>
    %47 = arith.mulf %43, %38 : vector<8x1xf32>
    %cst_25 = arith.constant dense<0.000000e+00> : vector<8xf32>
    %48 = vector.multi_reduction <add>, %46, %cst_25 [1] : vector<8x16xf32> to vector<8xf32>
    %49 = vector.shape_cast %48 : vector<8xf32> to vector<8x1xf32>
    %50 = arith.addf %47, %49 : vector<8x1xf32>
    %c0_26 = arith.constant 0 : index
    %c0_27 = arith.constant 0 : index
    %c0_28 = arith.constant 0 : index
    %51 = vector.load %arg12[%c0_26, %c0_27, %c0_28] : memref<2x8x1xf32, #tpu.memory_space<vmem>>, vector<1x8x1xf32>
    %52 = vector.shape_cast %51 : vector<1x8x1xf32> to vector<8x1xf32>
    %53 = vector.shape_cast %50 : vector<8x1xf32> to vector<1x8x1xf32>
    tpu.vector_store %arg12[%c0_26, %c0_27, %c0_28], %53 {strides = array<i32>} : memref<2x8x1xf32, #tpu.memory_space<vmem>>, vector<1x8x1xf32>,
    %c0_29 = arith.constant 0 : index
    %c0_30 = arith.constant 0 : index
    %c0_31 = arith.constant 0 : index
    %54 = vector.load %arg11[%c0_29, %c0_30, %c0_31] : memref<2x8x1xf32, #tpu.memory_space<vmem>>, vector<1x8x1xf32>
    %55 = vector.shape_cast %54 : vector<1x8x1xf32> to vector<8x1xf32>
    %56 = vector.shape_cast %41 : vector<8x1xf32> to vector<1x8x1xf32>
    tpu.vector_store %arg11[%c0_29, %c0_30, %c0_31], %56 {strides = array<i32>} : memref<2x8x1xf32, #tpu.memory_space<vmem>>, vector<1x8x1xf32>,
    %cst_32 = arith.constant dense<0.000000e+00> : vector<8x64xf32>
    %57 = tpu.matmul %46, %14, %cst_32 {dimension_numbers = #tpu.dot_dimension_numbers<[1], [0], [0], [1], [0, 0, 1, 1], [], []>} : vector<8x16xf32>, vector<16x64xf32>, vector<8x64xf32> -> vector<8x64xf32>
    %c0_33 = arith.constant 0 : index
    %c0_34 = arith.constant 0 : index
    %58 = vector.load %arg10[%c0_33, %c0_34] : memref<8x128xf32, #tpu.memory_space<vmem>>, vector<8x64xf32>
    %59 = vector.broadcast %43 : vector<8x1xf32> to vector<8x64xf32>
    %60 = arith.mulf %59, %58 : vector<8x64xf32>
    %61 = arith.addf %60, %57 : vector<8x64xf32>
    %c0_35 = arith.constant 0 : index
    %c0_36 = arith.constant 0 : index
    %62 = vector.load %arg10[%c0_35, %c0_36] : memref<8x128xf32, #tpu.memory_space<vmem>>, vector<8x64xf32>
    tpu.vector_store %arg10[%c0_35, %c0_36], %61 {strides = array<i32>} : memref<8x128xf32, #tpu.memory_space<vmem>>, vector<8x64xf32>,
    %c0_37 = arith.constant 0 : index
    %c0_38 = arith.constant 0 : index
    %c64 = arith.constant 64 : index
    %63 = vector.load %arg6[%c0_37, %c0_38, %c64] : memref<1x16x128xf32, #tpu.memory_space<vmem>>, vector<1x16x64xf32>
    %64 = vector.shape_cast %63 : vector<1x16x64xf32> to vector<16x64xf32>
    %c0_39 = arith.constant 0 : index
    %c0_40 = arith.constant 0 : index
    %c64_41 = arith.constant 64 : index
    %65 = vector.load %arg7[%c0_39, %c0_40, %c64_41] : memref<1x16x128xf32, #tpu.memory_space<vmem>>, vector<1x16x64xf32>
    %66 = vector.shape_cast %65 : vector<1x16x64xf32> to vector<16x64xf32>
    %cst_42 = arith.constant dense<0.000000e+00> : vector<16xf32>
    %67 = vector.multi_reduction <add>, %64, %cst_42 [1] : vector<16x64xf32> to vector<16xf32>
    %68 = vector.shape_cast %67 : vector<16xf32> to vector<16x1xf32>
    %cst_43 = arith.constant 6.400000e+01 : f32
    %69 = vector.broadcast %cst_43 : f32 to vector<16x1xf32>
    %70 = arith.divf %68, %69 : vector<16x1xf32>
    %71 = vector.broadcast %70 : vector<16x1xf32> to vector<16x64xf32>
    %72 = arith.subf %64, %71 : vector<16x64xf32>
    %73 = arith.mulf %72, %72 : vector<16x64xf32>
    %cst_44 = arith.constant dense<0.000000e+00> : vector<16xf32>
    %74 = vector.multi_reduction <add>, %73, %cst_44 [1] : vector<16x64xf32> to vector<16xf32>
    %75 = vector.shape_cast %74 : vector<16xf32> to vector<16x1xf32>
    %cst_45 = arith.constant 6.400000e+01 : f32
    %76 = vector.broadcast %cst_45 : f32 to vector<16x1xf32>
    %77 = arith.divf %75, %76 : vector<16x1xf32>
    %cst_46 = arith.constant 9.99999997E-7 : f32
    %78 = vector.broadcast %cst_46 : f32 to vector<16x1xf32>
    %79 = arith.addf %77, %78 : vector<16x1xf32>
    %80 = math.rsqrt %79 : vector<16x1xf32>
    %81 = vector.broadcast %80 : vector<16x1xf32> to vector<16x64xf32>
    %82 = arith.mulf %72, %81 : vector<16x64xf32>
    %83 = arith.mulf %82, %5 : vector<16x64xf32>
    %84 = arith.addf %83, %7 : vector<16x64xf32>
    %c0_47 = arith.constant 0 : index
    %c64_48 = arith.constant 64 : index
    %85 = vector.load %arg9[%c0_47, %c64_48] : memref<8x128xf32, #tpu.memory_space<vmem>>, vector<8x64xf32>
    %cst_49 = arith.constant dense<0.000000e+00> : vector<8x16xf32>
    %86 = tpu.matmul %85, %84, %cst_49 {dimension_numbers = #tpu.dot_dimension_numbers<[1], [1], [0], [0], [0, 0, 1, 0], [], []>} : vector<8x64xf32>, vector<16x64xf32>, vector<8x16xf32> -> vector<8x16xf32>
    %c1_50 = arith.constant 1 : index
    %c0_51 = arith.constant 0 : index
    %c0_52 = arith.constant 0 : index
    %87 = vector.load %arg11[%c1_50, %c0_51, %c0_52] : memref<2x8x1xf32, #tpu.memory_space<vmem>>, vector<1x8x1xf32>
    %88 = vector.shape_cast %87 : vector<1x8x1xf32> to vector<8x1xf32>
    %c1_53 = arith.constant 1 : index
    %c0_54 = arith.constant 0 : index
    %c0_55 = arith.constant 0 : index
    %89 = vector.load %arg12[%c1_53, %c0_54, %c0_55] : memref<2x8x1xf32, #tpu.memory_space<vmem>>, vector<1x8x1xf32>
    %90 = vector.shape_cast %89 : vector<1x8x1xf32> to vector<8x1xf32>
    %cst_56 = arith.constant dense<0xFF800000> : vector<8xf32>
    %91 = vector.multi_reduction <maximumf>, %86, %cst_56 [1] : vector<8x16xf32> to vector<8xf32>
    %92 = vector.shape_cast %91 : vector<8xf32> to vector<8x1xf32>
    %93 = arith.maximumf %88, %92 : vector<8x1xf32>
    %94 = arith.subf %88, %93 : vector<8x1xf32>
    %95 = math.exp %94 : vector<8x1xf32>
    %96 = vector.broadcast %93 : vector<8x1xf32> to vector<8x16xf32>
    %97 = arith.subf %86, %96 : vector<8x16xf32>
    %98 = math.exp %97 : vector<8x16xf32>
    %99 = arith.mulf %95, %90 : vector<8x1xf32>
    %cst_57 = arith.constant dense<0.000000e+00> : vector<8xf32>
    %100 = vector.multi_reduction <add>, %98, %cst_57 [1] : vector<8x16xf32> to vector<8xf32>
    %101 = vector.shape_cast %100 : vector<8xf32> to vector<8x1xf32>
    %102 = arith.addf %99, %101 : vector<8x1xf32>
    %c1_58 = arith.constant 1 : index
    %c0_59 = arith.constant 0 : index
    %c0_60 = arith.constant 0 : index
    %103 = vector.load %arg12[%c1_58, %c0_59, %c0_60] : memref<2x8x1xf32, #tpu.memory_space<vmem>>, vector<1x8x1xf32>
    %104 = vector.shape_cast %103 : vector<1x8x1xf32> to vector<8x1xf32>
    %105 = vector.shape_cast %102 : vector<8x1xf32> to vector<1x8x1xf32>
    tpu.vector_store %arg12[%c1_58, %c0_59, %c0_60], %105 {strides = array<i32>} : memref<2x8x1xf32, #tpu.memory_space<vmem>>, vector<1x8x1xf32>,
    %c1_61 = arith.constant 1 : index
    %c0_62 = arith.constant 0 : index
    %c0_63 = arith.constant 0 : index
    %106 = vector.load %arg11[%c1_61, %c0_62, %c0_63] : memref<2x8x1xf32, #tpu.memory_space<vmem>>, vector<1x8x1xf32>
    %107 = vector.shape_cast %106 : vector<1x8x1xf32> to vector<8x1xf32>
    %108 = vector.shape_cast %93 : vector<8x1xf32> to vector<1x8x1xf32>
    tpu.vector_store %arg11[%c1_61, %c0_62, %c0_63], %108 {strides = array<i32>} : memref<2x8x1xf32, #tpu.memory_space<vmem>>, vector<1x8x1xf32>,
    %cst_64 = arith.constant dense<0.000000e+00> : vector<8x64xf32>
    %109 = tpu.matmul %98, %66, %cst_64 {dimension_numbers = #tpu.dot_dimension_numbers<[1], [0], [0], [1], [0, 0, 1, 1], [], []>} : vector<8x16xf32>, vector<16x64xf32>, vector<8x64xf32> -> vector<8x64xf32>
    %c0_65 = arith.constant 0 : index
    %c64_66 = arith.constant 64 : index
    %110 = vector.load %arg10[%c0_65, %c64_66] : memref<8x128xf32, #tpu.memory_space<vmem>>, vector<8x64xf32>
    %111 = vector.broadcast %95 : vector<8x1xf32> to vector<8x64xf32>
    %112 = arith.mulf %111, %110 : vector<8x64xf32>
    %113 = arith.addf %112, %109 : vector<8x64xf32>
    %c0_67 = arith.constant 0 : index
    %c64_68 = arith.constant 64 : index
    %114 = vector.load %arg10[%c0_67, %c64_68] : memref<8x128xf32, #tpu.memory_space<vmem>>, vector<8x64xf32>
    tpu.vector_store %arg10[%c0_67, %c64_68], %113 {strides = array<i32>} : memref<8x128xf32, #tpu.memory_space<vmem>>, vector<8x64xf32>,
    %c0_i32_69 = arith.constant 0 : i32
    %115 = arith.cmpi eq, %arg3, %c0_i32_69 : i32
    %116 = arith.extui %115 : i1 to i32
    %c0_i32_70 = arith.constant 0 : i32
    %117 = arith.cmpi ne, %116, %c0_i32_70 : i32
    scf.if %117 {
      %c0_71 = arith.constant 0 : index
      %c0_72 = arith.constant 0 : index
      %c0_73 = arith.constant 0 : index
      %118 = vector.load %arg12[%c0_71, %c0_72, %c0_73] : memref<2x8x1xf32, #tpu.memory_space<vmem>>, vector<1x8x1xf32>
      %119 = vector.shape_cast %118 : vector<1x8x1xf32> to vector<8x1xf32>
      %120 = tpu.reciprocal %119 {approx = true} : vector<8x1xf32> -> vector<8x1xf32>
      %121 = arith.mulf %119, %120 : vector<8x1xf32>
      %cst_74 = arith.constant 2.000000e+00 : f32
      %122 = vector.broadcast %cst_74 : f32 to vector<8x1xf32>
      %123 = arith.subf %122, %121 : vector<8x1xf32>
      %124 = arith.mulf %120, %123 : vector<8x1xf32>
      %c0_75 = arith.constant 0 : index
      %c0_76 = arith.constant 0 : index
      %125 = vector.load %arg10[%c0_75, %c0_76] : memref<8x128xf32, #tpu.memory_space<vmem>>, vector<8x64xf32>
      %126 = vector.broadcast %124 : vector<8x1xf32> to vector<8x64xf32>
      %127 = arith.mulf %125, %126 : vector<8x64xf32>
      %c0_77 = arith.constant 0 : index
      %c0_78 = arith.constant 0 : index
      %128 = vector.load %arg10[%c0_77, %c0_78] : memref<8x128xf32, #tpu.memory_space<vmem>>, vector<8x64xf32>
      tpu.vector_store %arg10[%c0_77, %c0_78], %127 {strides = array<i32>} : memref<8x128xf32, #tpu.memory_space<vmem>>, vector<8x64xf32>,
      %c1_79 = arith.constant 1 : index
      %c0_80 = arith.constant 0 : index
      %c0_81 = arith.constant 0 : index
      %129 = vector.load %arg12[%c1_79, %c0_80, %c0_81] : memref<2x8x1xf32, #tpu.memory_space<vmem>>, vector<1x8x1xf32>
      %130 = vector.shape_cast %129 : vector<1x8x1xf32> to vector<8x1xf32>
      %131 = tpu.reciprocal %130 {approx = true} : vector<8x1xf32> -> vector<8x1xf32>
      %132 = arith.mulf %130, %131 : vector<8x1xf32>
      %cst_82 = arith.constant 2.000000e+00 : f32
      %133 = vector.broadcast %cst_82 : f32 to vector<8x1xf32>
      %134 = arith.subf %133, %132 : vector<8x1xf32>
      %135 = arith.mulf %131, %134 : vector<8x1xf32>
      %c0_83 = arith.constant 0 : index
      %c64_84 = arith.constant 64 : index
      %136 = vector.load %arg10[%c0_83, %c64_84] : memref<8x128xf32, #tpu.memory_space<vmem>>, vector<8x64xf32>
      %137 = vector.broadcast %135 : vector<8x1xf32> to vector<8x64xf32>
      %138 = arith.mulf %136, %137 : vector<8x64xf32>
      %c0_85 = arith.constant 0 : index
      %c64_86 = arith.constant 64 : index
      %139 = vector.load %arg10[%c0_85, %c64_86] : memref<8x128xf32, #tpu.memory_space<vmem>>, vector<8x64xf32>
      tpu.vector_store %arg10[%c0_85, %c64_86], %138 {strides = array<i32>} : memref<8x128xf32, #tpu.memory_space<vmem>>, vector<8x64xf32>,
      %c0_87 = arith.constant 0 : index
      %c0_88 = arith.constant 0 : index
      %140 = vector.load %arg10[%c0_87, %c0_88] : memref<8x128xf32, #tpu.memory_space<vmem>>, vector<8x128xf32>
      %c0_89 = arith.constant 0 : index
      %c0_90 = arith.constant 0 : index
      %c0_91 = arith.constant 0 : index
      %141 = vector.load %arg8[%c0_89, %c0_90, %c0_91] : memref<1x8x128xf32, #tpu.memory_space<vmem>>, vector<1x8x128xf32>
      %142 = vector.shape_cast %141 : vector<1x8x128xf32> to vector<8x128xf32>
      %143 = vector.shape_cast %140 : vector<8x128xf32> to vector<1x8x128xf32>
      tpu.vector_store %arg8[%c0_89, %c0_90, %c0_91], %143 {strides = array<i32>} : memref<1x8x128xf32, #tpu.memory_space<vmem>>, vector<1x8x128xf32>,
    } else {
    }
    return
  }
  func.func @transform_0(%arg0: i32, %arg1: i32, %arg2: i32, %arg3: i32) -> (i32, i32) {
    %c0_i32 = arith.constant 0 : i32
    %c0_i32_0 = arith.constant 0 : i32
    %c0_i32_1 = arith.constant 0 : i32
    return %c0_i32, %c0_i32_0 : i32, i32
  }
  func.func @transform_1(%arg0: i32, %arg1: i32, %arg2: i32, %arg3: i32) -> (i32, i32, i32) {
    %c0_i32 = arith.constant 0 : i32
    return %arg0, %arg2, %arg1 : i32, i32, i32
  }
  func.func @transform_2(%arg0: i32, %arg1: i32, %arg2: i32, %arg3: i32) -> (i32, i32, i32) {
    %c0_i32 = arith.constant 0 : i32
    return %arg0, %arg3, %arg1 : i32, i32, i32
  }
  func.func @transform_3(%arg0: i32, %arg1: i32, %arg2: i32, %arg3: i32) -> (i32, i32, i32) {
    %c0_i32 = arith.constant 0 : i32
    return %arg0, %arg3, %arg1 : i32, i32, i32
  }
  func.func @transform_4(%arg0: i32, %arg1: i32, %arg2: i32, %arg3: i32) -> (i32, i32, i32) {
    %c0_i32 = arith.constant 0 : i32
    return %arg0, %arg2, %arg1 : i32, i32, i32
  }
}

</mosaic_0001>

<bundles_post_ra>
// kernel: tpu_custom_call.1
= control target key start
LH: loop header
LB: loop body
LE: loop exit
PB: predicated region body
PF: predicated region fallthrough
CT: control target
= control target key end

     0   :  { %s2024_s0 = inlined_call_operand.hbm [shape: f32[4,64], index: 0, kind: input, shape index: {}]   ;;  %s2025_s1 = inlined_call_operand.hbm [shape: f32[2,8,128], index: 1, kind: input, shape index: {}]   ;;  %s2026_s2 = inlined_call_operand.hbm [shape: f32[2,16,128], index: 2, kind: input, shape index: {}]   ;;  %s2027_s3 = inlined_call_operand.hbm [shape: f32[2,16,128], index: 3, kind: input, shape index: {}]   ;;  %s2028_s4 = inlined_call_operand.hbm [shape: f32[2,8,128], index: 4, kind: output, shape index: {}]  }
   0x1   :  { %2045 = sst [smem:[#allocation23_spill]] %s2025_s1 }
   0x2   :  { %2046 = sst [smem:[#allocation24_spill]] %s2026_s2 }
   0x3   :  { %9 = vsyncpa [#allocation7], 0 }
   0x4   :  { %10 = vsyncpa [#allocation10], 0 }
   0x5   :  { %12 = vsyncpa [#allocation10 + $0x1], 0 }
   0x6   :  { %13 = vsyncpa [#allocation13], 0 }
   0x7   :  { %15 = vsyncpa [#allocation13 + $0x1], 0 }
   0x8   :  { %16 = vsyncpa [#allocation8], 0 }
   0x9   :  { %18 = vsyncpa [#allocation8 + $0x1], 0  ;;  %s1591_s15 = smov 0   ;;  %s1593_s16 = smov 0  }
   0xa   :  { %s1595_s17 = smov 0   ;;  %s1597_s18 = smov 0  }
   0xb   :  { %s1599_s19 = smov 0   ;;  %s1601_s20 = smov 0  }
   0xc LB: > { %2047 = sst [smem:[#allocation19_spill]] %s1539_s17  ;;  %s50_s21 = sadd.s32 1, %s1547_s19  ;;  %s1551_s20 = sphi %s1601_s20, %s24_s20   ;;  %s1547_s19 = sphi %s1599_s19, %s2085_s19   ;;  %s1543_s18 = sphi %s1597_s18, %s2084_s18   ;;  %s1539_s17 = sphi %s1595_s17, %s2080_s17   ;;  %s1535_s16 = sphi %s1593_s16, %s2083_s16   ;;  %s1531_s15 = sphi %s1591_s15, %s2082_s15  }
   0xd   : > { %2048 = sst [smem:[#allocation20_spill]] %s1551_s20  ;;  %s82_s22 = sadd.s32 1, %s1539_s17 }
   0xe   : > { %p52_p0 = scmp.ge.s32.totalorder %s50_s21, 2  ;;  %p2029_p1 = scmp.ne.s32.totalorder %s1539_s17, %s1535_s16 }
   0xf   : > { %p90_p2 = scmp.eq.s32.totalorder %s1551_s20, 0  ;;  %p1247_p5 = scmp.lt.s32.totalorder %s1551_s20, 2 }
  0x10   : > { %s2087_s21 = smov (%p52_p0, %s50_s21), 0  ;;  %s220_s24 = sand.u32 1, %s1551_s20  }
  0x11   : > { %2049 = sst [smem:[#allocation21_spill]] %s2087_s21  ;;  %p91_p4 = por %p90_p2, %p2029_p1 }
  0x12   : > { %s75_s23 = ssub.s32 %s1547_s19, %s2087_s21  ;;  %s1637_s25 = sand.u32 1, %s1539_s17  }
  0x13   : > { %p80_p6 = scmp.eq.s32.totalorder %s75_s23, 0  ;;  %s1131_s26 = sshll.u32 %s1547_s19, 7 }
  0x14   : > { %s1130_s28 = sshll.u32 %s1637_s25, 3  ;;  %s2051_s1 = sld [smem:[#allocation23_spill]] }
  0x15   : > { %s1641_s27 = scalar_select %p80_p6, %s1539_s17, %s82_s22  }
  0x16   : > { %p1649_p7 = pnand %p1247_p5, %p91_p4  ;;  %s224_s7 = scalar_lea.vmem [#allocation9], %s1130_s28 }
  0x17   : > { %2050 = sst [smem:[#allocation22_spill]] %s1641_s27  ;;  %s233_s8 = sshll.u32 %s224_s7, 4  ;;  %s1654_s8 = int_to_ptr.vmem [resolvable:$true] %s233_s8 }
  0x18   : > { %s2052_s6 = scalar_select %p1649_p7, 1, 0 }
  0x19   : > { %s2030_s9 = sshll.u32 %s1637_s25, 4  ;;  %s1656_s10 = scalar_lea.sflag [#allocation10], %s220_s24 }
  0x1a   : > { %s1647_s5 = scalar_lea.hbm %s2051_s1, %s1131_s26  ;;  %p1662_p9 = pneg %p1649_p7 }
  0x1b   : > { %s1343_s11 = scalar_lea.hbm %s1647_s5, 128  ;;  %s1348_s22 = scalar_lea.hbm %s2051_s1, 256 }
  0x1c   : > { %p1344_p8 = scmp.ne.s32.totalorder %s1647_s5, %s1343_s11  ;;  %p1349_p12 = scmp.lt.u32.totalorder %s1647_s5, %s2051_s1 }
  0x1d   : > { %s2053_s12 = scalar_select %p1662_p9, 1, 0 }
  0x1e   : > { %p1346_p10 = pnand %p1662_p9, %p1344_p8  ;;  %p1350_p13 = scmp.lt.u32.totalorder %s1348_s22, %s1343_s11 }
  0x1f   : > { %p1352_p2 = scmp.lt.u32.totalorder %s1343_s11, %s1647_s5 }
  0x20   : > { %p1347_p11 = pneg %p1346_p10  ;;  %p1351_p0 = por %p1350_p13, %p1349_p12 }
  0x22   : > { %p1353_p4 = por %p1352_p2, %p1351_p0 }
  0x24   : > { %p1354_p5 = pnand %p1353_p4, %p1347_p11 }
  0x26   : > { %1357 = shalt.err (!%p1354_p5)
}
  0x27   : > { %s1358_s24 = scalar_lea.vmem %s1654_s8, 128  ;;  %s1553_s28 = smov [#allocation9]  }
  0x28   : > { %p1359_p6 = scmp.ne.s32.totalorder %s1654_s8, %s1358_s24  ;;  %s1363_s29 = sshll.u32 %s1553_s28, 4  ;;  %s1364_s29 = int_to_ptr.vmem [resolvable:$false] %s1363_s29 }
  0x29   : > { %s1365_s30 = scalar_lea.vmem %s1364_s29, 256  ;;  %p1366_p3 = scmp.lt.s32.totalorder %s1654_s8, %s1364_s29 }
  0x2a   : > { %p1361_p8 = pnand %p1359_p6, %p1662_p9  ;;  %p1367_p1 = scmp.lt.s32.totalorder %s1365_s30, %s1358_s24 }
  0x2c   : > { %p1362_p10 = pneg %p1361_p8  ;;  %p1368_p12 = por %p1367_p1, %p1366_p3 }
  0x2e   : > { %p1369_p13 = pnand %p1368_p12, %p1362_p10 }
  0x30   : > { %1372 = shalt.err (!%p1369_p13)
}
  0x31   : > { %1235 = dma.hbm_to_vmem [thread:$0]  (!%p1649_p7), %s1647_s5, 128, %s1654_s8, %s1656_s10  }
  0x32   : > { %s2031_s7 = sshll.u32 %s1547_s19, 8  ;;  %s244_s11 = scalar_lea.vmem [#allocation11], %s2030_s9 }
  0x33   : > { %s254_s13 = sshll.u32 %s244_s11, 4  ;;  %s1692_s14 = sadd.s32 4294967295, %s1551_s20   ;;  %s1689_s13 = int_to_ptr.vmem [resolvable:$true] %s254_s13 }
  0x34   : > { %s1126_s22 = sadd.s32 4294967294, %s1551_s20   ;;  %p95_p1 = scmp.ne.s32.totalorder %s1535_s16, %s1531_s15 }
  0x35   : > { %p2032_p3 = scmp.eq.s32.totalorder %s1692_s14, 0  ;;  %p183_p11 = scmp.eq.s32.totalorder %s1692_s14, 1 }
  0x36   : > { %p189_p0 = scmp.eq.s32.totalorder %s1126_s22, 1  ;;  %p1127_p4 = scmp.ge.s32.totalorder %s1551_s20, 1 }
  0x37   : > { %p1701_p2 = por %p2032_p3, %p95_p1  ;;  %p2055_p5 = scmp.ne.s32.totalorder %s1539_s17, %s1535_s16 }
  0x38   : > { %p1713_p8 = por %p189_p0, %p95_p1  ;;  %p196_p10 = scmp.lt.s32.totalorder %s1551_s20, 3 }
  0x39   : > { %s2054_s5 = scalar_select %p1701_p2, 1, 0 }
  0x3a   : > { %p1709_p6 = por %p183_p11, %p2055_p5  ;;  %s2058_s2 = sld [smem:[#allocation24_spill]] }
  0x3b   : > { %s2057_s23 = scalar_select %p1713_p8, 1, 0 }
  0x3c   : > { %s2056_s8 = scalar_select %p1709_p6, 1, 0 }
  0x3d   : > { %p1725_p12 = pnand %p1127_p4, %p196_p10  ;;  %s1554_s30 = smov [#allocation6]  }
  0x3e   : > { %s209_s11 = sshll.u32 %s1554_s30, 4  ;;  %s1729_s11 = int_to_ptr.vmem [resolvable:$true] %s209_s11 }
  0x3f   : > { %s2059_s29 = scalar_select %p1725_p12, 1, 0 }
  0x40   : > { %s1723_s28 = scalar_lea.hbm %s2058_s2, %s2031_s7  ;;  %s1378_s9 = scalar_lea.hbm %s2058_s2, 512 }
  0x41   : > { %s1373_s22 = scalar_lea.hbm %s1723_s28, 256  ;;  %p1379_p4 = scmp.lt.u32.totalorder %s1723_s28, %s2058_s2 }
  0x42   : > { %p1374_p1 = scmp.ne.s32.totalorder %s1723_s28, %s1373_s22  ;;  %p1380_p5 = scmp.lt.u32.totalorder %s1378_s9, %s1373_s22 }
  0x43   : > { %p1382_p3 = scmp.lt.u32.totalorder %s1373_s22, %s1723_s28 }
  0x44   : > { %p1376_p11 = pnand %p1374_p1, %p1662_p9  ;;  %p1381_p10 = por %p1380_p5, %p1379_p4 }
  0x46   : > { %p1377_p0 = pneg %p1376_p11  ;;  %p1383_p8 = por %p1382_p3, %p1381_p10 }
  0x48   : > { %p1384_p6 = pnand %p1383_p8, %p1377_p0 }
  0x4a   : > { %1387 = shalt.err (!%p1384_p6)
}
  0x4b   : > { %s1388_s30 = scalar_lea.vmem %s1689_s13, 256  ;;  %s1555_s26 = smov [#allocation11]  }
  0x4c   : > { %p1389_p1 = scmp.ne.s32.totalorder %s1689_s13, %s1388_s30  ;;  %s1393_s24 = sshll.u32 %s1555_s26, 4  ;;  %s1394_s24 = int_to_ptr.vmem [resolvable:$false] %s1393_s24 }
  0x4d   : > { %s1395_s1 = scalar_lea.vmem %s1394_s24, 512  ;;  %p1396_p2 = scmp.lt.s32.totalorder %s1689_s13, %s1394_s24 }
  0x4e   : > { %p1391_p11 = pnand %p1389_p1, %p1662_p9  ;;  %p1397_p12 = scmp.lt.s32.totalorder %s1395_s1, %s1388_s30 }
  0x50   : > { %p1392_p13 = pneg %p1391_p11  ;;  %p1398_p4 = por %p1397_p12, %p1396_p2 }
  0x52   : > { %p1399_p5 = pnand %p1398_p4, %p1392_p13 }
  0x54   : > { %1402 = shalt.err (!%p1399_p5)
}
  0x55   : > { %s2041_s9 = smov 128   ;;  %s1557_s7 = smov 8  }
  0x56   : > { %1238 = dma.hbm_to_vmem [thread:$0]  (!%p1649_p7), %s1723_s28, 256, %s1689_s13, %s1656_s10, %s2041_s9, %s2041_s9, %s1557_s7  }
  0x57   : > { %p2060_p3 = scmp.eq.s32.totalorder %s1692_s14, 0  ;;  %p2061_p6 = scmp.ne.s32.totalorder %s2059_s29, 0 }
  0x58   : > { %s2064_s30 = sshll.u32 %s1547_s19, 8  ;;  %s2065_s2 = sshll.u32 %s1637_s25, 4 }
  0x59   : > { %p2062_p2 = pneg %p2061_p6  ;;  %s1772_s1 = scalar_lea.hbm %s2027_s3, %s2064_s30 }
  0x5a   : > { %s268_s21 = scalar_lea.vmem [#allocation12], %s2065_s2  ;;  %s1403_s10 = scalar_lea.hbm %s2024_s0, 64 }
  0x5b   : > { %p1763_p8 = pnand %p2062_p2, %p2060_p3  ;;  %s278_s27 = sshll.u32 %s268_s21, 4  ;;  %s1797_s27 = int_to_ptr.vmem [resolvable:$true] %s278_s27 }
  0x5c   : > { %p1404_p12 = scmp.ne.s32.totalorder %s2024_s0, %s1403_s10  ;;  %p1410_p1 = scmp.lt.u32.totalorder %s1403_s10, %s2024_s0 }
  0x5d   : > { %p1405_p13 = pneg %p1763_p8 }
  0x5f   : > { %p1406_p0 = pnand %p1405_p13, %p1404_p12 }
  0x61   : > { %p1407_p10 = pneg %p1406_p0 }
  0x63   : > { %p1412_p11 = pnand %p1410_p1, %p1407_p10 }
  0x65   : > { %1415 = shalt.err (!%p1412_p11)
}
  0x66   : > { %s1416_s2 = scalar_lea.vmem %s1729_s11, 64  ;;  %p1424_p2 = scmp.lt.s32.totalorder %s1729_s11, %s1729_s11 }
  0x67   : > { %p1417_p4 = scmp.ne.s32.totalorder %s1729_s11, %s1416_s2  ;;  %p1425_p6 = scmp.lt.s32.totalorder %s1416_s2, %s1416_s2 }
  0x69   : > { %p1419_p5 = pnand %p1417_p4, %p1405_p13  ;;  %p1426_p7 = por %p1425_p6, %p1424_p2 }
  0x6b   : > { %p1420_p3 = pneg %p1419_p5 }
  0x6d   : > { %p1427_p9 = pnand %p1426_p7, %p1420_p3 }
  0x6f   : > { %1430 = shalt.err (!%p1427_p9)
}
  0x70   : > { %1231 = dma.hbm_to_vmem [thread:$0]  (!%p1763_p8), %s2024_s0, 64, %s1729_s11, [#allocation7]  }
  0x71   : > { %s265_s21 = scalar_lea.sflag [#allocation13], %s1637_s25  ;;  %s1431_s9 = scalar_lea.hbm %s1772_s1, 256 }
  0x72   : > { %p1432_p6 = scmp.ne.s32.totalorder %s1772_s1, %s1431_s9  ;;  %p2066_p7 = scmp.ne.s32.totalorder %s2053_s12, 0 }
  0x73   : > { %s1436_s24 = scalar_lea.hbm %s2027_s3, 512  ;;  %p1437_p13 = scmp.lt.u32.totalorder %s1772_s1, %s2027_s3 }
  0x74   : > { %p1434_p9 = pnand %p1432_p6, %p2066_p7  ;;  %p1438_p0 = scmp.lt.u32.totalorder %s1436_s24, %s1431_s9 }
  0x75   : > { %p1440_p1 = scmp.lt.u32.totalorder %s1431_s9, %s1772_s1 }
  0x76   : > { %p1435_p12 = pneg %p1434_p9  ;;  %p1439_p10 = por %p1438_p0, %p1437_p13 }
  0x78   : > { %p1441_p8 = por %p1440_p1, %p1439_p10 }
  0x7a   : > { %p1442_p11 = pnand %p1441_p8, %p1435_p12 }
  0x7c   : > { %1445 = shalt.err (!%p1442_p11)
}
  0x7d   : > { %s1446_s11 = scalar_lea.vmem %s1797_s27, 256  ;;  %s1558_s28 = smov [#allocation12]  }
  0x7e   : > { %p1447_p4 = scmp.ne.s32.totalorder %s1797_s27, %s1446_s11  ;;  %s1451_s26 = sshll.u32 %s1558_s28, 4  ;;  %s1452_s26 = int_to_ptr.vmem [resolvable:$false] %s1451_s26 }
  0x7f   : > { %s1453_s2 = scalar_lea.vmem %s1452_s26, 512  ;;  %p1454_p2 = scmp.lt.s32.totalorder %s1797_s27, %s1452_s26 }
  0x80   : > { %p1449_p5 = pnand %p1447_p4, %p2066_p7  ;;  %p1455_p6 = scmp.lt.s32.totalorder %s1453_s2, %s1446_s11 }
  0x82   : > { %p1450_p3 = pneg %p1449_p5  ;;  %p1456_p9 = por %p1455_p6, %p1454_p2 }
  0x84   : > { %p1457_p13 = pnand %p1456_p9, %p1450_p3 }
  0x86   : > { %1460 = shalt.err (!%p1457_p13)
}
  0x87   : > { %p2067_p12 = scmp.ne.s32.totalorder %s2052_s6, 0  ;;  %s2068_s17 = smov 128  }
  0x88   : > { %p2069_p7 = scmp.ne.s32.totalorder %s2059_s29, 0 }
  0x89   : > { %1241 = dma.hbm_to_vmem [thread:$0]  (!%p2067_p12), %s1772_s1, 256, %s1797_s27, %s265_s21, %s2068_s17, %s2068_s17, %s1557_s7  }
  0x8a   : > { %290 = sbr.rel (%p2069_p7) target bundleno = 2123 (0x84b), region = 36  ;;  %p2070_p0 = scmp.eq.s32.totalorder (!%p2069_p7), %s1692_s14, 0 }
  0x91   : > { %1514 = dma.done.wait (%p2070_p0), [#allocation7], 64   ;;  %p2071_p10 = pmov %p2070_p0 }
  0x92   : > { %s296_s6 = sand.u32 1, %s1692_s14   ;;  %s1834_s12 = sand.u32 1, %s1535_s16  }
  0x93   : > { %1516 = vsyncadd (%p2071_p10), [#allocation7], 4294967232  ;;  %s1140_s25 = sshll.u32 %s1834_s12, 3  ;;  %s297_s20 = scalar_lea.sflag [#allocation10], %s296_s6 }
  0x94   : > { %s300_s27 = scalar_lea.vmem [#allocation9], %s1140_s25  ;;  %p2072_p1 = scmp.ne.s32.totalorder %s2054_s5, 0 }
  0x96   : > { %1518 = dma.done.wait (%p2072_p1), %s297_s20, 384  }
  0x97   : > { %1520 = vsyncadd (%p2072_p1), %s297_s20, 4294966912  ;;  %s1141_s29 = sshll.u32 %s1834_s12, 4  ;;  %s315_s1 = scalar_lea.sflag [#allocation13], %s1834_s12 }
  0x98   : > { %s309_s7 = scalar_lea.vmem [#allocation11], %s1141_s29  ;;  %s1845_s14 = scalar_lea.vmem [#allocation12], %s1141_s29 }
  0x99   : > { %1522 = dma.done.wait (%p2072_p1), %s315_s1, 256  }
  0x9a   : > { %1524 = vsyncadd (%p2072_p1), %s315_s1, 4294967040  ;;  %vm386_vm0 = vcmask 523264   ;;  %v404_v0 = vld [vmem:[%s300_s27] sm:$0xff]  ;;  %v1851_v1 = vld [vmem:[%s309_s7] sm:$0xff]  ;;  %s1559_s21 = smov 64   ;;  %v1560_v19 = vmov 0.0|0.0  }
  0x9b   : > { %406 = vrot.lane.b32.xlu0 %v404_v0, %s1559_s21  ;;  %v387_v2 = vsel %vm386_vm0, %v404_v0, 0.0  ;;  %v443_v3 = vsel %vm386_vm0, %v1851_v1, 0.0  ;;  %v1857_v4 = vld [vmem:[%s309_s7 + $0x8] sm:$0xff]  ;;  %1202 = vmatprep.subr.bf16.mxu0 %v1560_v19  ;;  %vm1885_vm1 = vmpackc.low %vm386_vm0, %vm386_vm0  ;;  %vm1561_vm2 = vmmov 0   ;;  %v1562_v50 = vmov 0.0   ;;  %s1157_s5 = sshll.u32 %s1543_s18, 7 }
  0x9c   : > { %388 = vadd.xlane.f32.xlu1 %v387_v2  ;;  %v446_v5 = vsel %vm386_vm0, %v1857_v4, 0.0  ;;  %1206 = vmatprep.subr.bf16.mxu1 %v1560_v19  ;;  %v1874_v35 = vld [vmem:[#allocation6 + $0x2] ss:$0 sm:$0xff]  ;;  %v1877_v39 = vld [vmem:[#allocation6 + $0x3] ss:$0 sm:$0xff]  ;;  %376 = vst [vmem:[#allocation3] sm:$0xff] %v1562_v50  ;;  %s1975_s10 = scalar_lea.hbm %s2028_s4, %s1157_s5 }
  0x9d   : > { %v1147_v40 = vld [vmem:[#allocation6 + $0x1] ss:$0 sm:$0xff]  ;;  %v1146_v49 = vld [vmem:[#allocation6] ss:$0 sm:$0xff]  ;;  %1178 = vmatprep.mubr.msk.f32.mxu0 %vm1561_vm2, %v1562_v50  ;;  %1185 = vmatprep.mubr.msk.f32.mxu1 %vm1561_vm2, %v1562_v50  ;;  %vm436_vm3 = vcmask 1048064   ;;  %vm371_vm4 = vcmask 7168  }
  0x9e   : > { %374 = vst.msk [vmem:[#allocation5] sm:$0xff] %vm371_vm4, %v1562_v50  ;;  %375 = vst.msk [vmem:[#allocation5 + $0x8] sm:$0xff] %vm371_vm4, %v1562_v50  ;;  %vm556_vm5 = vcmask 130048   ;;  %s352_s9 = scalar_lea.vmem [#allocation14], %s1140_s25  ;;  %s959_s13 = scalar_lea.sflag [#allocation8], %s1834_s12 }
  0x9f   : > { %s974_s22 = sshll.u32 %s352_s9, 4  ;;  %p2075_p11 = scmp.ne.s32.totalorder %s2056_s8, 0  ;;  %s1977_s22 = int_to_ptr.vmem [resolvable:$true] %s974_s22 }
  0xa0   : > { %444 = vadd.xlane.f32.xlu1 %v443_v3  ;;  %s1461_s11 = scalar_lea.vmem %s1977_s22, 128  ;;  %s1565_s18 = smov [#allocation14]  }
  0xa1   : > { %p1462_p8 = scmp.ne.s32.totalorder %s1977_s22, %s1461_s11  ;;  %s1465_s28 = sshll.u32 %s1565_s18, 4  ;;  %s1466_s28 = int_to_ptr.vmem [resolvable:$false] %s1465_s28 }
  0xa2   : > { %s1467_s26 = scalar_lea.vmem %s1466_s28, 256  ;;  %p1468_p3 = scmp.lt.s32.totalorder %s1977_s22, %s1466_s28 }
  0xa3   : > { %p1463_p4 = pnand %p1462_p8, %p2075_p11  ;;  %p1469_p2 = scmp.lt.s32.totalorder %s1467_s26, %s1461_s11 }
  0xa4   : > { %447 = vadd.xlane.f32.xlu1 %v446_v5 }
  0xa5   : > { %p1464_p5 = pneg %p1463_p4  ;;  %p1470_p6 = por %p1469_p2, %p1468_p3 }
  0xa7   : > { %p1471_p9 = pnand %p1470_p6, %p1464_p5 }
 0x10d   : > { %v407_v6 = vpop.permute.xlu0 %406 }
 0x10e   : > { %v409_v7 = vsel %vm386_vm0, %v407_v6, 0.0 }
 0x10f   : > { %410 = vadd.xlane.f32.xlu0 %v409_v7 }
 0x129   : > { %v389_v8 = vpop.xlane.xlu1 %388 }
 0x12a   : > { %v391_v24 = vmul.f32 0.015625, %v389_v8 }
 0x12c   : > { %v392_v25 = vsub.f32 %v404_v0, %v391_v24 }
 0x12d   : > { %v445_v9 = vpop.xlane.xlu1 %444 }
 0x12e   : > { %v450_v10 = vmul.f32 0.015625, %v445_v9  ;;  %v393_v26 = vmul.f32 %v392_v25, %v392_v25 }
 0x130   : > { %v452_v11 = vsub.f32 %v1851_v1, %v450_v10  ;;  %v394_v29 = vsel %vm386_vm0, %v393_v26, 0.0 }
 0x131   : > { %v448_v12 = vpop.xlane.xlu1 %447 }
 0x132   : > { %v451_v13 = vmul.f32 0.015625, %v448_v12  ;;  %v454_v14 = vmul.f32 %v452_v11, %v452_v11 }
 0x134   : > { %v453_v15 = vsub.f32 %v1857_v4, %v451_v13  ;;  %v456_v16 = vsel %vm386_vm0, %v454_v14, 0.0 }
 0x135   : > { %457 = vadd.xlane.f32.xlu0 %v456_v16 }
 0x136   : > { %v455_v17 = vmul.f32 %v453_v15, %v453_v15 }
 0x138   : > { %v459_v18 = vsel %vm386_vm0, %v455_v17, 0.0 }
 0x139   : > { %460 = vadd.xlane.f32.xlu0 %v459_v18  ;;  %v1563_v18 = vmov -inf  }
 0x13a   : > { %372 = vst.msk [vmem:[#allocation4] sm:$0xff] %vm371_vm4, %v1563_v18  ;;  %373 = vst.msk [vmem:[#allocation4 + $0x8] sm:$0xff] %vm371_vm4, %v1563_v18 }
 0x141   : > { %v1931_v26 = vld [vmem:[#allocation4] sm:$0xff] }
 0x19c   : > { %v411_v20 = vpop.xlane.xlu0 %410 }
 0x19d   : > { %v412_v21 = vmul.f32 0.015625, %v411_v20 }
 0x19f   : > { %v1868_v22 = vsub.f32 %v404_v0, %v412_v21  ;;  %v1564_v21 = vmov 0  }
 0x1a0   : > { %1307 = vset.pattern.permute.xlu0 %v1564_v21  ;;  %1313 = vset.pattern.permute.xlu1 %v1564_v21 }
 0x1a1   : > { %v414_v23 = vmul.f32 %v1868_v22, %v1868_v22 }
 0x1a3   : > { %416 = vrot.lane.b32.xlu1 %v414_v23, %s1559_s21 }
 0x1c2   : > { %v458_v27 = vpop.xlane.xlu0 %457 }
 0x1c3   : > { %v462_v28 = vmul.f32 0.015625, %v458_v27 }
 0x1c5   : > { %v464_v30 = vadd.f32 1e-06, %v462_v28 }
 0x1c6   : > { %v461_v31 = vpop.xlane.xlu0 %460 }
 0x1c7   : > { %395 = vadd.xlane.f32.xlu1 %v394_v29  ;;  %1319 = vrsqrt.f32 %v464_v30  ;;  %v463_v32 = vmul.f32 0.015625, %v461_v31  ;;  %v440_v30 = vld [vmem:[%s1845_s14] sm:$0xff]  ;;  %v441_v31 = vld [vmem:[%s1845_s14 + $0x8] sm:$0xff] }
 0x1c9   : > { %v465_v33 = vadd.f32 1e-06, %v463_v32  ;;  %v1207_v32 = vpack.c.bf16 %v441_v31, %v440_v30 }
 0x1cb   : > { %1321 = vrsqrt.f32 %v465_v33  ;;  %1208 = vmatpush3.bf16.msra.mxu1 %v1207_v32 }
 0x1cc   : > { %1209 = vmatprep.subr.bf16.mxu1 %v1560_v19 }
 0x1d1   : > { %v1320_v34 = vpop.eup %1319 }
 0x1d2   : > { %v468_v36 = vmul.f32 %v1320_v34, %v452_v11 }
 0x1d4   : > { %v470_v37 = vmul.f32 %v1874_v35, %v468_v36 }
 0x1d5   : > { %v1322_v38 = vpop.eup %1321 }
 0x1d6   : > { %v469_v41 = vmul.f32 %v1322_v38, %v453_v15  ;;  %v472_v43 = vadd.f32 %v1877_v39, %v470_v37 }
 0x1d8   : > { %v471_v42 = vmul.f32 %v1874_v35, %v469_v41  ;;  %432 = vrot.lane.b32.xlu1 %v1147_v40, %s1559_s21 }
 0x1da   : > { %v473_v44 = vadd.f32 %v1877_v39, %v471_v42 }
 0x1dc   : > { %v1203_v46 = vpack.c.bf16 %v473_v44, %v472_v43 }
 0x1de   : > { %1205 = vmatpush3.bf16.xpose.msk.msra.mxu0 %vm1885_vm1, %v1203_v46 }
 0x1df   : > { %1213 = vmatprep.subr.bf16.mxu0 %v1560_v19 }
 0x215   : > { %v417_v47 = vpop.permute.xlu1 %416 }
 0x216   : > { %v419_v48 = vsel %vm386_vm0, %v417_v47, 0.0 }
 0x217   : > { %420 = vadd.xlane.f32.xlu0 %v419_v48 }
 0x22d   : > { %427 = vrot.lane.b32.xlu0 %v1146_v49, %s1559_s21 }
 0x231   : > { %668 = vrot.lane.b32.xlu0 %v1851_v1, %s1559_s21 }
 0x235   : > { %670 = vrot.lane.b32.xlu0 %v1857_v4, %s1559_s21 }
 0x254   : > { %v396_v51 = vpop.xlane.xlu1 %395 }
 0x255   : > { %v397_v52 = vmul.f32 0.015625, %v396_v51 }
 0x257   : > { %v398_v53 = vadd.f32 1e-06, %v397_v52 }
 0x258   : > { %v433_v6 = vpop.permute.xlu1 %432 }
 0x259   : > { %1323 = vrsqrt.f32 %v398_v53 }
 0x263   : > { %v1324_v54 = vpop.eup %1323 }
 0x264   : > { %v400_v55 = vmul.f32 %v1324_v54, %v392_v25 }
 0x266   : > { %v401_v56 = vmul.f32 %v1146_v49, %v400_v55 }
 0x268   : > { %v402_v57 = vadd.f32 %v1147_v40, %v401_v56 }
 0x26a   : > { %403 = vst.msk [vmem:[#allocation2] sm:$0xff] %vm386_vm0, %v402_v57 }
 0x2a4   : > { %v421_v58 = vpop.xlane.xlu0 %420 }
 0x2a5   : > { %v422_v59 = vmul.f32 0.015625, %v421_v58 }
 0x2a7   : > { %v423_v60 = vadd.f32 1e-06, %v422_v59 }
 0x2a8   : > { %v428_v61 = vpop.permute.xlu0 %427 }
 0x2a9   : > { %1325 = vrsqrt.f32 %v423_v60 }
 0x2ac   : > { %v669_v62 = vpop.permute.xlu0 %668 }
 0x2ad   : > { %v674_v63 = vsel %vm386_vm0, %v669_v62, 0.0 }
 0x2ae   : > { %675 = vadd.xlane.f32.xlu0 %v674_v63 }
 0x2b0   : > { %v671_v0 = vpop.permute.xlu0 %670 }
 0x2b1   : > { %v677_v2 = vsel %vm386_vm0, %v671_v0, 0.0 }
 0x2b2   : > { %678 = vadd.xlane.f32.xlu1 %v677_v2  ;;  %v807_v2 = vld [vmem:[#allocation4 + $0x8] sm:$0xff] }
 0x2b3   : > { %v1326_v3 = vpop.eup %1325 }
 0x2b4   : > { %v425_v5 = vmul.f32 %v1326_v3, %v1868_v22 }
 0x2b6   : > { %v430_v7 = vmul.f32 %v428_v61, %v425_v5  ;;  %v1314_v5 = vpack.i.bf16 %v441_v31, %v440_v30 }
 0x2b8   : > { %v435_v8 = vadd.f32 %v433_v6, %v430_v7 }
 0x2ba   : > { %437 = vst.msk [vmem:[#allocation2] sm:$0xff] %vm436_vm3, %v435_v8 }
 0x2c1   : > { %v1908_v9 = vld [vmem:[#allocation2] sm:$0xff] }
 0x2c2   : > { %1179 = vmatmul.mubr.msk.f32.vlgmr.msra.gmra.mrb[0].mxu0 %vm386_vm0, %v1908_v9 }
 0x2c3   : > { %1199 = vmatprep.mubr.msk.f32.mxu0 %vm1561_vm2, %v1562_v50 }
 0x33b   : > { %v676_v10 = vpop.xlane.xlu0 %675 }
 0x33c   : > { %v680_v11 = vmul.f32 0.015625, %v676_v10 }
 0x33e   : > { %v682_v12 = vsub.f32 %v1851_v1, %v680_v11 }
 0x33f   : > { %v679_v13 = vpop.xlane.xlu1 %678 }
 0x340   : > { %v681_v14 = vmul.f32 0.015625, %v679_v13  ;;  %v684_v15 = vmul.f32 %v682_v12, %v682_v12 }
 0x342   : > { %v683_v16 = vsub.f32 %v1857_v4, %v681_v14  ;;  %688 = vrot.lane.b32.xlu0 %v684_v15, %s1559_s21 }
 0x344   : > { %v685_v17 = vmul.f32 %v683_v16, %v683_v16 }
 0x346   : > { %690 = vrot.lane.b32.xlu1 %v685_v17, %s1559_s21 }
 0x395   : > { %v550_v1 = vpop.f32.mrb[0].mxu0 }
 0x396   : > { %v1180_v4 = vpop.f32.mrb[1].mxu0  ;;  %v557_v20 = vsel %vm556_vm5, %v550_v1, -inf }
 0x397   : > { %558 = vmax.xlane.f32.xlu0 %v557_v20  ;;  %v555_v4 = vld [vmem:[#allocation5] sm:$0xff] }
 0x3b4   : > { %v689_v22 = vpop.permute.xlu0 %688 }
 0x3b5   : > { %v694_v23 = vsel %vm386_vm0, %v689_v22, 0.0 }
 0x3b6   : > { %695 = vadd.xlane.f32.xlu1 %v694_v23  ;;  %v809_v23 = vld [vmem:[#allocation5 + $0x8] sm:$0xff] }
 0x3b8   : > { %v691_v24 = vpop.permute.xlu1 %690 }
 0x3b9   : > { %v697_v25 = vsel %vm386_vm0, %v691_v24, 0.0 }
 0x3ba   : > { %698 = vadd.xlane.f32.xlu0 %v697_v25 }
 0x3c7   : > { %715 = vrot.lane.b32.xlu1 %v1877_v39, %s1559_s21 }
 0x3d0   : > { %709 = vrot.lane.b32.xlu0 %v1874_v35, %s1559_s21 }
 0x424   : > { %v559_v27 = vpop.xlane.xlu0 %558 }
 0x425   : > { %v1934_v28 = vmax.f32 %v1931_v26, %v559_v27 }
 0x427   : > { %v561_v29 = vsub.f32 %v1931_v26, %v1934_v28  ;;  %579 = vst.msk [vmem:[#allocation4] sm:$0xff] %vm371_vm4, %v1934_v28  ;;  %566 = vperm.xlu0 %1307, %v1934_v28  }
 0x429   : > { %v562_v18 = vmul.f32 1.442695, %v561_v29 }
 0x443   : > { %v696_v33 = vpop.xlane.xlu1 %695 }
 0x444   : > { %v700_v34 = vmul.f32 0.015625, %v696_v33 }
 0x446   : > { %v702_v35 = vadd.f32 1e-06, %v700_v34 }
 0x447   : > { %v699_v36 = vpop.xlane.xlu0 %698  ;;  %v716_v46 = vpop.permute.xlu1 %715 }
 0x448   : > { %1327 = vrsqrt.f32 %v702_v35  ;;  %v701_v37 = vmul.f32 0.015625, %v699_v36 }
 0x44a   : > { %v703_v38 = vadd.f32 1e-06, %v701_v37 }
 0x44b   : > { %v710_v41 = vpop.permute.xlu0 %709 }
 0x44c   : > { %1329 = vrsqrt.f32 %v703_v38 }
 0x452   : > { %v1328_v39 = vpop.eup %1327 }
 0x453   : > { %v706_v40 = vmul.f32 %v1328_v39, %v682_v12 }
 0x455   : > { %v712_v44 = vmul.f32 %v710_v41, %v706_v40 }
 0x456   : > { %v1330_v42 = vpop.eup %1329 }
 0x457   : > { %v707_v43 = vmul.f32 %v1330_v42, %v683_v16  ;;  %v718_v48 = vadd.f32 %v716_v46, %v712_v44 }
 0x459   : > { %v713_v47 = vmul.f32 %v710_v41, %v707_v43 }
 0x45b   : > { %v719_v49 = vadd.f32 %v716_v46, %v713_v47 }
 0x45d   : > { %v1308_v51 = vpack.i.bf16 %v719_v49, %v718_v48 }
 0x45f   : > { %1309 = vrot.lane.b32.xlu1 %v1308_v51, %s1559_s21 }
 0x463   : > { %722 = vrot.lane.b32.xlu1 %v1908_v9, %s1559_s21 }
 0x4a6   : > { %v567_v19 = vpop.permute.xlu0 %566 }
 0x4a7   : > { %v569_v52 = vsub.f32 %v550_v1, %v567_v19 }
 0x4a9   : > { %v570_v53 = vmul.f32 1.442695, %v569_v52 }
 0x4ab   : > { %1331 = vpow2.f32 %v570_v53 }
 0x4b5   : > { %v1332_v54 = vpop.eup %1331 }
 0x4b6   : > { %1186 = vmatmul.mubr.msk.f32.vlgmr.msra.gmra.mrb[0].mxu1 %vm556_vm5, %v1332_v54  ;;  %v573_v6 = vsel %vm556_vm5, %v1332_v54, 0.0 }
 0x4b7   : > { %1192 = vmatprep.mubr.msk.f32.mxu1 %vm1561_vm2, %v1562_v50 }
 0x4d1   : > { %v1310_v55 = vpop.permute.xlu1 %1309 }
 0x4d2   : > { %v1312_v56 = vunpack.i.h.bf16 %v1310_v55  ;;  %v1311_v57 = vunpack.i.l.bf16 %v1310_v55 }
 0x4d4   : > { %v1210_v58 = vpack.c.bf16 %v1312_v56, %v1311_v57 }
 0x4d5   : > { %v723_v59 = vpop.permute.xlu1 %722 }
 0x4d6   : > { %1212 = vmatpush3.bf16.xpose.msk.msra.mxu1 %vm1885_vm1, %v1210_v58 }
 0x4dd   : > { %1193 = vmatmul.mubr.msk.f32.vlgmr.msra.gmra.mrb[2].mxu1 %vm386_vm0, %v723_v59 }
 0x589   : > { %v649_v60 = vpop.f32.mrb[0].mxu1 }
 0x58a   : > { %v1187_v61 = vpop.f32.mrb[1].mxu1 }
 0x5b0   : > { %v802_v62 = vpop.f32.mrb[2].mxu1 }
 0x5b1   : > { %v1194_v63 = vpop.f32.mrb[3].mxu1  ;;  %v810_v0 = vsel %vm556_vm5, %v802_v62, -inf }
 0x5b2   : > { %811 = vmax.xlane.f32.xlu0 %v810_v0 }
 0x63f   : > { %v812_v3 = vpop.xlane.xlu0 %811 }
 0x640   : > { %v813_v50 = vmax.f32 %v807_v2, %v812_v3 }
 0x642   : > { %831 = vst.msk [vmem:[#allocation4 + $0x8] sm:$0xff] %vm371_vm4, %v813_v50  ;;  %819 = vperm.xlu1 %1313, %v813_v50   ;;  %v814_v45 = vsub.f32 %v807_v2, %v813_v50 }
 0x644   : > { %v815_v7 = vmul.f32 1.442695, %v814_v45 }
 0x646   : > { %1315 = vrot.lane.b32.xlu1 %v1314_v5, %s1559_s21  ;;  %1333 = vpow2.f32 %v815_v7 }
 0x650   : > { %v1334_v8 = vpop.eup %1333 }
 0x651   : > { %v825_v24 = vmul.f32 %v1334_v8, %v809_v23 }
 0x66a   : > { %574 = vadd.xlane.f32.xlu1 %v573_v6 }
 0x67b   : > { %916 = vperm.xlu1 %1313, %v1334_v8  }
 0x6c1   : > { %v820_v9 = vpop.permute.xlu1 %819 }
 0x6c2   : > { %v822_v10 = vsub.f32 %v802_v62, %v820_v9 }
 0x6c4   : > { %v823_v11 = vmul.f32 1.442695, %v822_v10 }
 0x6c5   : > { %v1316_v12 = vpop.permute.xlu1 %1315 }
 0x6c6   : > { %1335 = vpow2.f32 %v823_v11  ;;  %v1318_v13 = vunpack.i.h.bf16 %v1316_v12  ;;  %v1317_v14 = vunpack.i.l.bf16 %v1316_v12 }
 0x6c7   : > { %1337 = vpow2.f32 %v562_v18 }
 0x6c8   : > { %v1214_v15 = vpack.c.bf16 %v1318_v13, %v1317_v14 }
 0x6ca   : > { %1215 = vmatpush3.bf16.msra.mxu0 %v1214_v15 }
 0x6d0   : > { %v1336_v16 = vpop.eup %1335 }
 0x6d1   : > { %1200 = vmatmul.mubr.msk.f32.vlgmr.msra.gmra.mrb[2].mxu0 %vm556_vm5, %v1336_v16  ;;  %v826_v17 = vsel %vm556_vm5, %v1336_v16, 0.0  ;;  %v1338_v1 = vpop.eup %1337 }
 0x6d2   : > { %827 = vadd.xlane.f32.xlu0 %v826_v17  ;;  %v572_v20 = vmul.f32 %v1338_v1, %v555_v4 }
 0x6e8   : > { %656 = vperm.xlu0 %1307, %v1338_v1  }
 0x6f7   : > { %v575_v21 = vpop.xlane.xlu1 %574 }
 0x6f8   : > { %v576_v22 = vadd.f32 %v575_v21, %v572_v20 }
 0x6fa   : > { %578 = vst.msk [vmem:[#allocation5] sm:$0xff] %vm371_vm4, %v576_v22 }
 0x6fb   : > { %v917_v43 = vpop.permute.xlu1 %916 }
 0x701   : > { %v930_v35 = vld [vmem:[#allocation5] sm:$0xff] }
 0x75f   : > { %v828_v25 = vpop.xlane.xlu0 %827 }
 0x760   : > { %v829_v27 = vadd.f32 %v828_v25, %v825_v24 }
 0x762   : > { %830 = vst.msk [vmem:[#allocation5 + $0x8] sm:$0xff] %vm371_vm4, %v829_v27 }
 0x767   : > { %v657_v30 = vpop.permute.xlu0 %656 }
 0x768   : > { %v659_v31 = vmul.f32 0.0, %v657_v30 }
 0x769   : > { %v943_v32 = vld [vmem:[#allocation5 + $0x8] sm:$0xff] }
 0x76a   : > { %v660_v26 = vadd.f32 %v659_v31, %v649_v60  ;;  %1339 = vrcp.f32 %v943_v32 }
 0x76b   : > { %1341 = vrcp.f32 %v930_v35 }
 0x76c   : > { %661 = vst.msk [vmem:[#allocation3] sm:$0xff] %vm386_vm0, %v660_v26 }
 0x773   : > { %v913_v42 = vld [vmem:[#allocation3] sm:$0xff] }
 0x774   : > { %v1340_v28 = vpop.eup %1339  ;;  %v919_v44 = vmul.f32 %v917_v43, %v913_v42 }
 0x775   : > { %v945_v29 = vmul.f32 %v1340_v28, %v943_v32  ;;  %v1342_v36 = vpop.eup %1341 }
 0x776   : > { %v932_v37 = vmul.f32 %v1342_v36, %v930_v35 }
 0x777   : > { %v946_v33 = vsub.f32 2.0, %v945_v29 }
 0x778   : > { %v933_v38 = vsub.f32 2.0, %v932_v37 }
 0x779   : > { %v947_v34 = vmul.f32 %v1340_v28, %v946_v33 }
 0x77a   : > { %v934_v41 = vmul.f32 %v1342_v36, %v933_v38 }
 0x77b   : > { %951 = vperm.xlu1 %1313, %v947_v34  }
 0x7a4   : > { %v909_v39 = vpop.f32.mrb[2].mxu0 }
 0x7a5   : > { %921 = vrot.lane.b32.xlu0 %v909_v39, %s1559_s21  ;;  %v1201_v40 = vpop.f32.mrb[3].mxu0 }
 0x7a9   : > { %938 = vperm.xlu0 %1307, %v934_v41  }
 0x7fa   : > { %v952_v19 = vpop.permute.xlu1 %951 }
 0x817   : > { %v922_v46 = vpop.permute.xlu0 %921 }
 0x818   : > { %v924_v47 = vadd.f32 %v922_v46, %v919_v44 }
 0x81a   : > { %926 = vst.msk [vmem:[#allocation3] sm:$0xff] %vm436_vm3, %v924_v47 }
 0x821   : > { %v935_v48 = vld [vmem:[#allocation3] sm:$0xff] }
 0x828   : > { %v939_v49 = vpop.permute.xlu0 %938 }
 0x829   : > { %v941_v51 = vmul.f32 %v939_v49, %v935_v48 }
 0x82b   : > { %942 = vst.msk [vmem:[#allocation3] sm:$0xff] %vm386_vm0, %v941_v51 }
 0x832   : > { %v948_v52 = vld [vmem:[#allocation3] sm:$0xff] }
 0x833   : > { %v954_v53 = vmul.f32 %v952_v19, %v948_v52 }
 0x835   : > { %955 = vst.msk [vmem:[#allocation3] sm:$0xff] %vm436_vm3, %v954_v53 }
 0x83c   : > { %v956_v54 = vld [vmem:[#allocation3] sm:$0xff] }
 0x83d   : > { %957 = vst [vmem:[%s352_s9] sm:$0xff] %v956_v54 }
 0x83e   : > { %1474 = shalt.err (!%p1471_p9)
}
 0x83f   : > { %s1475_s2 = scalar_lea.hbm %s1975_s10, 128  ;;  %s1479_s12 = scalar_lea.hbm %s2028_s4, 256 }
 0x840   : > { %p1476_p13 = scmp.ne.s32.totalorder %s1975_s10, %s1475_s2  ;;  %p1480_p0 = scmp.lt.u32.totalorder %s1975_s10, %s2028_s4 }
 0x841   : > { %p1481_p10 = scmp.lt.u32.totalorder %s1479_s12, %s1475_s2  ;;  %p1483_p8 = scmp.lt.u32.totalorder %s1475_s2, %s1975_s10 }
 0x842   : > { %p1477_p12 = pnand %p1476_p13, %p2075_p11 }
 0x843   : > { %p1482_p1 = por %p1481_p10, %p1480_p0 }
 0x844   : > { %p1478_p7 = pneg %p1477_p12 }
 0x845   : > { %p1484_p4 = por %p1483_p8, %p1482_p1 }
 0x847   : > { %p1485_p5 = pnand %p1484_p4, %p1478_p7 }
 0x849   : > { %1488 = shalt.err (!%p1485_p5)
}
 0x84a   : > { %1226 = dma.vmem_to_hbm [thread:$0]  (%p2075_p11), %s1977_s22, 128, %s1975_s10, %s959_s13  }
 0x84b PF: > { %s2076_s27 = sld [smem:[#allocation20_spill]]  ;;  %s986_s29 = sand.u32 1, %s1531_s15  }
 0x84c   : > { %p2077_p3 = scmp.ne.s32.totalorder %s2057_s23, 0  ;;  %s987_s7 = scalar_lea.sflag [#allocation8], %s986_s29 }
 0x851   : > { %p2078_p2 = scmp.ge.s32.totalorder %s2076_s27, 2 }
 0x853   : > { %p1243_p6 = pnand %p2078_p2, %p2077_p3 }
 0x855   : > { %1526 = dma.done.wait (!%p1243_p6), %s987_s7, 128  }
 0x856   : > { %1528 = vsyncadd (!%p1243_p6), %s987_s7, 4294967168  ;;  %s24_s20 = sadd.s32 1, %s2076_s27   ;;  %s2079_s1 = sld [smem:[#allocation19_spill]] }
 0x857   : > { %p21_p9 = scmp.ge.s32.totalorder %s24_s20, 4   ;;  %s2080_s17 = sld [smem:[#allocation22_spill]] }
 0x858   : > { %s2081_s8 = sld [smem:[#allocation21_spill]]  ;;  %s2082_s15 = smov %s1535_s16 }
 0x859   : > { %s2084_s18 = smov %s1547_s19  ;;  %23 = sbr.rel (!%p21_p9) target bundleno = 12 (0xc), region = 120 }
 0x85c   : > { %s2083_s16 = smov %s2079_s1 }
 0x85e   : > { %s2085_s19 = smov %s2081_s8 }
 0x860   :  { %992 = vsyncpa [#allocation7], 1 }
 0x861   :  { %994 = vsyncpa [#allocation7 + $0x1], 1 }
 0x862   :  { %995 = vsyncpa [#allocation10], 1 }
 0x863   :  { %997 = vsyncpa [#allocation10 + $0x1], 1 }
 0x864   :  { %998 = vsyncpa [#allocation13], 1 }
 0x865   :  { %1000 = vsyncpa [#allocation13 + $0x1], 1 }
 0x866   :  { %1001 = vsyncpa [#allocation8], 1 }
 0x867   :  { %1003 = vsyncpa [#allocation8 + $0x1], 1 }

</bundles_post_ra>
